<compile_context>
chip_gen: v5e
topology: v5e:2x2
jax: 0.10.0
libtpu: 0.0.40
codegen_flags: <defaults>
</compile_context>

<pallas_src>
import math
import functools

import jax
import jax.numpy as jnp
from jax import lax
from jax.experimental import pallas as pl
from jax.experimental.pallas import tpu as pltpu


_MASK_VALUE = -1e30


def _pick_tile(n: int, target: int) -> int:
    """Largest tile <= target that divides n and satisfies TPU tiling rules."""
    if n <= target:
        return n
    for t in range(target, 7, -1):
        if n % t == 0 and t % 8 == 0:
            return t
    return n  # full extent is always legal


# ----------------------------------------------------------------------------
# Kernel 1: fused QKV projection + per-head split.
# ----------------------------------------------------------------------------
def _qkv_kernel(x_ref, w_ref, b_ref, q_ref, k_ref, v_ref, *, n_head, head_dim):
    H, D = n_head, head_dim
    xb = x_ref[0]                                   # (bt, C), operand dtype
    bt, C = xb.shape

    qkv = jnp.dot(xb, w_ref[...], preferred_element_type=jnp.float32)
    qkv = qkv + b_ref[...].astype(jnp.float32)      # (bt, 3C)

    q = qkv[:, 0 * C:1 * C]                         # scale already folded in
    k = qkv[:, 1 * C:2 * C]
    v = qkv[:, 2 * C:3 * C]

    # (bt, C) -> (H, bt, D): small relayout, O(T*C) per block.
    q_ref[0] = q.reshape(bt, H, D).transpose(1, 0, 2).astype(q_ref.dtype)
    k_ref[0] = k.reshape(bt, H, D).transpose(1, 0, 2).astype(k_ref.dtype)
    v_ref[0] = v.reshape(bt, H, D).transpose(1, 0, 2).astype(v_ref.dtype)


# ----------------------------------------------------------------------------
# Kernel 2: flash attention, all heads per step, online softmax,
#           causal block skipping.
# ----------------------------------------------------------------------------
def _flash_kernel(q_ref, k_ref, v_ref, o_ref, m_scr, l_scr, acc_scr, *, tq, tk):
    qi = pl.program_id(1)
    ki = pl.program_id(2)
    nkv = pl.num_programs(2)

    q_start = qi * tq
    kv_start = ki * tk
    # Last KV block that can contain any unmasked key for this Q block.
    last_needed = (q_start + tq - 1) // tk

    @pl.when(ki == 0)
    def _init():
        m_scr[...] = jnp.full(m_scr.shape, _MASK_VALUE, dtype=m_scr.dtype)
        l_scr[...] = jnp.zeros(l_scr.shape, dtype=l_scr.dtype)
        acc_scr[...] = jnp.zeros(acc_scr.shape, dtype=acc_scr.dtype)

    # Skip KV tiles entirely above the diagonal.
    @pl.when(ki <= last_needed)
    def _compute():
        q = q_ref[0]                                 # (H, tq, D)
        k = k_ref[0]                                 # (H, tk, D)
        # q @ k^T per head, no transpose: contract last dims, batch over H.
        s = jnp.einsum('hqd,hkd->hqk', q, k,
                       preferred_element_type=jnp.float32)     # (H, tq, tk)

        row = q_start + lax.broadcasted_iota(jnp.int32, (tq, tk), 0)
        col = kv_start + lax.broadcasted_iota(jnp.int32, (tq, tk), 1)
        s = jnp.where(col <= row, s, _MASK_VALUE)    # broadcast over H

        m_prev = m_scr[...]                          # (H, tq, 1)
        m_new = jnp.maximum(m_prev, jnp.max(s, axis=-1, keepdims=True))
        alpha = jnp.exp(m_prev - m_new)
        p = jnp.exp(s - m_new)                       # (H, tq, tk), f32

        l_scr[...] = alpha * l_scr[...] + jnp.sum(p, axis=-1, keepdims=True)
        acc_scr[...] = alpha * acc_scr[...] + jnp.einsum(
            'hqk,hkd->hqd', p.astype(v_ref.dtype), v_ref[0],
            preferred_element_type=jnp.float32)
        m_scr[...] = m_new

    @pl.when(ki == nkv - 1)
    def _finalize():
        inv_l = pl.reciprocal(l_scr[...], approx=True)
        o_ref[0] = (acc_scr[...] * inv_l).astype(o_ref.dtype)


# ----------------------------------------------------------------------------
# Kernel 3: merge heads + output projection.
# ----------------------------------------------------------------------------
def _merge_proj_kernel(o_ref, w_ref, b_ref, y_ref):
    H, bt, D = o_ref.shape[1], o_ref.shape[2], o_ref.shape[3]
    ob = o_ref[0]                                    # (H, bt, D)
    ob = ob.transpose(1, 0, 2).reshape(bt, H * D)    # (bt, C)
    y = jnp.dot(ob, w_ref[...], preferred_element_type=jnp.float32)
    y = y + b_ref[...].astype(jnp.float32)
    y_ref[0] = y.astype(y_ref.dtype)


# ----------------------------------------------------------------------------
# Wrapper
# ----------------------------------------------------------------------------
def self_attention(x, w_attn, b_attn, w_proj, b_proj, n_head: int,
                   *, attn_tile: int = 256, row_tile: int = 256):
    """Forward pass of the PyTorch SelfAttention module (dropout = identity).

    x:       (B, T, C), any float dtype (bf16 recommended on TPU)
    w_attn:  (3C, C)  nn.Linear weight (torch orientation)
    b_attn:  (3C,)
    w_proj:  (C, C)
    b_proj:  (C,)
    """
    B, T, C = x.shape
    H = n_head
    D = C // H
    dt = x.dtype

    # --- host-side weight prep (once): transpose to x @ W orientation and
    # fold 1/sqrt(D) into the Q output columns.
    scale = 1.0 / math.sqrt(D)
    scale_vec = jnp.concatenate([jnp.full((C,), scale, jnp.float32),
                                 jnp.ones((2 * C,), jnp.float32)])
    wt_attn = (w_attn.astype(jnp.float32).T * scale_vec[None, :]).astype(dt)  # (C, 3C)
    b_attn2 = (b_attn.astype(jnp.float32) * scale_vec).reshape(1, 3 * C).astype(dt)
    wt_proj = w_proj.astype(jnp.float32).T.astype(dt)                          # (C, C)
    b_proj2 = b_proj.reshape(1, C).astype(dt)

    bt = _pick_tile(T, row_tile)
    tq = tk = _pick_tile(T, attn_tile)
    nbt = T // bt
    nq = T // tq
    nkv = T // tk

    # ---- 1) QKV projection + head split -> q, k, v of shape (B, H, T, D)
    qkv_fn = functools.partial(_qkv_kernel, n_head=H, head_dim=D)
    q, k, v = pl.pallas_call(
        qkv_fn,
        out_shape=tuple(jax.ShapeDtypeStruct((B, H, T, D), dt) for _ in range(3)),
        grid_spec=pltpu.PrefetchScalarGridSpec(
            num_scalar_prefetch=0,
            grid=(B, nbt),
            in_specs=[
                pl.BlockSpec((1, bt, C), lambda b, t: (b, t, 0)),
                pl.BlockSpec((C, 3 * C), lambda b, t: (0, 0)),
                pl.BlockSpec((1, 3 * C), lambda b, t: (0, 0)),
            ],
            out_specs=[
                pl.BlockSpec((1, H, bt, D), lambda b, t: (b, 0, t, 0)),
                pl.BlockSpec((1, H, bt, D), lambda b, t: (b, 0, t, 0)),
                pl.BlockSpec((1, H, bt, D), lambda b, t: (b, 0, t, 0)),
            ],
        ),
        compiler_params=pltpu.CompilerParams(
            dimension_semantics=("parallel", "parallel")),
    )(x, wt_attn, b_attn2)

    # ---- 2) flash attention (all heads per step) -> o of shape (B, H, T, D)
    flash_fn = functools.partial(_flash_kernel, tq=tq, tk=tk)
    o = pl.pallas_call(
        flash_fn,
        out_shape=jax.ShapeDtypeStruct((B, H, T, D), dt),
        grid_spec=pltpu.PrefetchScalarGridSpec(
            num_scalar_prefetch=0,
            grid=(B, nq, nkv),
            in_specs=[
                pl.BlockSpec((1, H, tq, D), lambda b, qi, ki: (b, 0, qi, 0)),
                pl.BlockSpec((1, H, tk, D), lambda b, qi, ki: (b, 0, ki, 0)),
                pl.BlockSpec((1, H, tk, D), lambda b, qi, ki: (b, 0, ki, 0)),
            ],
            out_specs=pl.BlockSpec((1, H, tq, D),
                                   lambda b, qi, ki: (b, 0, qi, 0)),
            scratch_shapes=[
                pltpu.VMEM((H, tq, 1), jnp.float32),   # running max
                pltpu.VMEM((H, tq, 1), jnp.float32),   # running denom
                pltpu.VMEM((H, tq, D), jnp.float32),   # output accumulator
            ],
        ),
        compiler_params=pltpu.CompilerParams(
            dimension_semantics=("parallel", "parallel", "arbitrary")),
    )(q, k, v)

    # ---- 3) merge heads + output projection -> (B, T, C)
    y = pl.pallas_call(
        _merge_proj_kernel,
        out_shape=jax.ShapeDtypeStruct((B, T, C), dt),
        grid_spec=pltpu.PrefetchScalarGridSpec(
            num_scalar_prefetch=0,
            grid=(B, nbt),
            in_specs=[
                pl.BlockSpec((1, H, bt, D), lambda b, t: (b, 0, t, 0)),
                pl.BlockSpec((C, C), lambda b, t: (0, 0)),
                pl.BlockSpec((1, C), lambda b, t: (0, 0)),
            ],
            out_specs=pl.BlockSpec((1, bt, C), lambda b, t: (b, t, 0)),
        ),
        compiler_params=pltpu.CompilerParams(
            dimension_semantics=("parallel", "parallel")),
    )(o, wt_proj, b_proj2)

    return y


# ----------------------------------------------------------------------------
# Pure-JAX reference mirroring the PyTorch forward (dropout off).
# ----------------------------------------------------------------------------
def _reference(x, w_attn, b_attn, w_proj, b_proj, n_head: int):
    B, T, C = x.shape
    H, D = n_head, C // n_head
    qkv = x @ w_attn.T + b_attn
    q, k, v = jnp.split(qkv, 3, axis=2)
    q = q.reshape(B, T, H, D).transpose(0, 2, 1, 3)
    k = k.reshape(B, T, H, D).transpose(0, 2, 1, 3)
    v = v.reshape(B, T, H, D).transpose(0, 2, 1, 3)
    att = (q @ jnp.swapaxes(k, -2, -1)) * (1.0 / math.sqrt(D))
    mask = jnp.tril(jnp.ones((T, T)))[None, None]
    att = jnp.where(mask == 0, -jnp.inf, att)
    att = jax.nn.softmax(att, axis=-1)
    out = att @ v
    out = out.transpose(0, 2, 1, 3).reshape(B, T, C)
    return out @ w_proj.T + b_proj


if __name__ == "__main__":
    def run_case(B, T, C, H, dtype, atol, rtol, name):
        key = jax.random.PRNGKey(0)
        kx, k1, k2, k3, k4 = jax.random.split(key, 5)
        x = jax.random.normal(kx, (B, T, C), jnp.float32)
        lim = 1.0 / math.sqrt(C)
        w_attn = jax.random.uniform(k1, (3 * C, C), jnp.float32, -lim, lim)
        b_attn = jax.random.uniform(k2, (3 * C,), jnp.float32, -lim, lim)
        w_proj = jax.random.uniform(k3, (C, C), jnp.float32, -lim, lim)
        b_proj = jax.random.uniform(k4, (C,), jnp.float32, -lim, lim)

        out = self_attention(x.astype(dtype), w_attn, b_attn, w_proj, b_proj,
                             n_head=H)
        out = jax.block_until_ready(out)

        ref = _reference(x, w_attn, b_attn, w_proj, b_proj, n_head=H)
        assert out.shape == (B, T, C), name
        assert jnp.allclose(out.astype(jnp.float32), ref,
                            atol=atol, rtol=rtol), f"mismatch vs reference: {name}"

    # Module's test config: num_head=4, embdd_dim=32, T=8, dropout off.
    run_case(2, 8, 32, 4, jnp.float32, 1e-2, 1e-2, "f32 small")
    # bf16 operands (MXU-friendly path), looser tolerance.
    run_case(2, 8, 32, 4, jnp.bfloat16, 1e-1, 1e-1, "bf16 small")
    # Multi-tile case exercising flash tiling + causal block skipping.
    run_case(1, 512, 128, 4, jnp.float32, 1e-2, 1e-2, "f32 tiled")

    print("KERNEL_OK")
</pallas_src>

<mosaic_0001>
module attributes {stable_mosaic.version = 11 : i64} {
  func.func @_qkv_kernel(%arg0: i32, %arg1: i32, %arg2: memref<1x8x32xf32, #tpu.memory_space<vmem>>, %arg3: memref<32x96xf32, #tpu.memory_space<vmem>>, %arg4: memref<1x96xf32, #tpu.memory_space<vmem>>, %arg5: memref<1x4x8x8xf32, #tpu.memory_space<vmem>>, %arg6: memref<1x4x8x8xf32, #tpu.memory_space<vmem>>, %arg7: memref<1x4x8x8xf32, #tpu.memory_space<vmem>>) attributes {dimension_semantics = [#tpu.dimension_semantics<parallel>, #tpu.dimension_semantics<parallel>], iteration_bounds = array<i64: 2, 1>, scalar_prefetch = 0 : i64, scratch_operands = 0 : i64, tpu.core_type = #tpu.core_type<tc>, window_params = [{transform_indices = @transform_0, window_bounds = array<i64: 1, 8, 32>}, {pipeline_mode = #tpu.pipeline_mode<synchronous>, transform_indices = @transform_1, window_bounds = array<i64: 32, 96>}, {pipeline_mode = #tpu.pipeline_mode<synchronous>, transform_indices = @transform_2, window_bounds = array<i64: 1, 96>}, {transform_indices = @transform_3, window_bounds = array<i64: 1, 4, 8, 8>}, {transform_indices = @transform_4, window_bounds = array<i64: 1, 4, 8, 8>}, {transform_indices = @transform_5, window_bounds = array<i64: 1, 4, 8, 8>}]} {
    %c0 = arith.constant 0 : index
    %c0_0 = arith.constant 0 : index
    %c0_1 = arith.constant 0 : index
    %0 = vector.load %arg2[%c0, %c0_0, %c0_1] : memref<1x8x32xf32, #tpu.memory_space<vmem>>, vector<1x8x32xf32>
    %1 = vector.shape_cast %0 : vector<1x8x32xf32> to vector<8x32xf32>
    %c0_2 = arith.constant 0 : index
    %c0_3 = arith.constant 0 : index
    %2 = vector.load %arg3[%c0_2, %c0_3] : memref<32x96xf32, #tpu.memory_space<vmem>>, vector<32x96xf32>
    %cst = arith.constant dense<0.000000e+00> : vector<8x96xf32>
    %3 = tpu.matmul %1, %2, %cst {dimension_numbers = #tpu.dot_dimension_numbers<[1], [0], [0], [1], [0, 0, 1, 1], [], []>} : vector<8x32xf32>, vector<32x96xf32>, vector<8x96xf32> -> vector<8x96xf32>
    %c0_4 = arith.constant 0 : index
    %c0_5 = arith.constant 0 : index
    %4 = vector.load %arg4[%c0_4, %c0_5] : memref<1x96xf32, #tpu.memory_space<vmem>>, vector<1x96xf32>
    %5 = vector.broadcast %4 : vector<1x96xf32> to vector<8x96xf32>
    %6 = arith.addf %3, %5 : vector<8x96xf32>
    %7 = vector.extract_strided_slice %6 {offsets = [0, 0], sizes = [8, 32], strides = [1, 1]} : vector<8x96xf32> to vector<8x32xf32>
    %8 = vector.extract_strided_slice %6 {offsets = [0, 32], sizes = [8, 32], strides = [1, 1]} : vector<8x96xf32> to vector<8x32xf32>
    %9 = vector.extract_strided_slice %6 {offsets = [0, 64], sizes = [8, 32], strides = [1, 1]} : vector<8x96xf32> to vector<8x32xf32>
    %10 = vector.shape_cast %7 : vector<8x32xf32> to vector<8x4x8xf32>
    %11 = tpu.transpose %10, [1, 0, 2] : vector<8x4x8xf32> -> vector<4x8x8xf32>
    %c0_6 = arith.constant 0 : index
    %c0_7 = arith.constant 0 : index
    %c0_8 = arith.constant 0 : index
    %c0_9 = arith.constant 0 : index
    %12 = vector.load %arg5[%c0_6, %c0_7, %c0_8, %c0_9] : memref<1x4x8x8xf32, #tpu.memory_space<vmem>>, vector<1x4x8x8xf32>
    %13 = vector.shape_cast %12 : vector<1x4x8x8xf32> to vector<4x8x8xf32>
    %14 = vector.shape_cast %11 : vector<4x8x8xf32> to vector<1x4x8x8xf32>
    tpu.vector_store %arg5[%c0_6, %c0_7, %c0_8, %c0_9], %14 {strides = array<i32>} : memref<1x4x8x8xf32, #tpu.memory_space<vmem>>, vector<1x4x8x8xf32>,
    %15 = vector.shape_cast %8 : vector<8x32xf32> to vector<8x4x8xf32>
    %16 = tpu.transpose %15, [1, 0, 2] : vector<8x4x8xf32> -> vector<4x8x8xf32>
    %c0_10 = arith.constant 0 : index
    %c0_11 = arith.constant 0 : index
    %c0_12 = arith.constant 0 : index
    %c0_13 = arith.constant 0 : index
    %17 = vector.load %arg6[%c0_10, %c0_11, %c0_12, %c0_13] : memref<1x4x8x8xf32, #tpu.memory_space<vmem>>, vector<1x4x8x8xf32>
    %18 = vector.shape_cast %17 : vector<1x4x8x8xf32> to vector<4x8x8xf32>
    %19 = vector.shape_cast %16 : vector<4x8x8xf32> to vector<1x4x8x8xf32>
    tpu.vector_store %arg6[%c0_10, %c0_11, %c0_12, %c0_13], %19 {strides = array<i32>} : memref<1x4x8x8xf32, #tpu.memory_space<vmem>>, vector<1x4x8x8xf32>,
    %20 = vector.shape_cast %9 : vector<8x32xf32> to vector<8x4x8xf32>
    %21 = tpu.transpose %20, [1, 0, 2] : vector<8x4x8xf32> -> vector<4x8x8xf32>
    %c0_14 = arith.constant 0 : index
    %c0_15 = arith.constant 0 : index
    %c0_16 = arith.constant 0 : index
    %c0_17 = arith.constant 0 : index
    %22 = vector.load %arg7[%c0_14, %c0_15, %c0_16, %c0_17] : memref<1x4x8x8xf32, #tpu.memory_space<vmem>>, vector<1x4x8x8xf32>
    %23 = vector.shape_cast %22 : vector<1x4x8x8xf32> to vector<4x8x8xf32>
    %24 = vector.shape_cast %21 : vector<4x8x8xf32> to vector<1x4x8x8xf32>
    tpu.vector_store %arg7[%c0_14, %c0_15, %c0_16, %c0_17], %24 {strides = array<i32>} : memref<1x4x8x8xf32, #tpu.memory_space<vmem>>, vector<1x4x8x8xf32>,
    return
  }
  func.func @transform_0(%arg0: i32, %arg1: i32) -> (i32, i32, i32) {
    %c0_i32 = arith.constant 0 : i32
    %c0_i32_0 = arith.constant 0 : i32
    return %arg0, %arg1, %c0_i32 : i32, i32, i32
  }
  func.func @transform_1(%arg0: i32, %arg1: i32) -> (i32, i32) {
    %c0_i32 = arith.constant 0 : i32
    %c0_i32_0 = arith.constant 0 : i32
    %c0_i32_1 = arith.constant 0 : i32
    return %c0_i32, %c0_i32_0 : i32, i32
  }
  func.func @transform_2(%arg0: i32, %arg1: i32) -> (i32, i32) {
    %c0_i32 = arith.constant 0 : i32
    %c0_i32_0 = arith.constant 0 : i32
    %c0_i32_1 = arith.constant 0 : i32
    return %c0_i32, %c0_i32_0 : i32, i32
  }
  func.func @transform_3(%arg0: i32, %arg1: i32) -> (i32, i32, i32, i32) {
    %c0_i32 = arith.constant 0 : i32
    %c0_i32_0 = arith.constant 0 : i32
    %c0_i32_1 = arith.constant 0 : i32
    return %arg0, %c0_i32, %arg1, %c0_i32_0 : i32, i32, i32, i32
  }
  func.func @transform_4(%arg0: i32, %arg1: i32) -> (i32, i32, i32, i32) {
    %c0_i32 = arith.constant 0 : i32
    %c0_i32_0 = arith.constant 0 : i32
    %c0_i32_1 = arith.constant 0 : i32
    return %arg0, %c0_i32, %arg1, %c0_i32_0 : i32, i32, i32, i32
  }
  func.func @transform_5(%arg0: i32, %arg1: i32) -> (i32, i32, i32, i32) {
    %c0_i32 = arith.constant 0 : i32
    %c0_i32_0 = arith.constant 0 : i32
    %c0_i32_1 = arith.constant 0 : i32
    return %arg0, %c0_i32, %arg1, %c0_i32_0 : i32, i32, i32, i32
  }
}

</mosaic_0001>

<bundles_post_ra>
// kernel: tpu_custom_call.1
= control target key start
LH: loop header
LB: loop body
LE: loop exit
PB: predicated region body
PF: predicated region fallthrough
CT: control target
= control target key end

     0   :  { %s1666_s0 = inlined_call_operand.hbm [shape: f32[2,8,32], index: 0, kind: input, shape index: {}]   ;;  %s1667_s1 = inlined_call_operand.hbm [shape: f32[32,96], index: 1, kind: input, shape index: {}]   ;;  %s1668_s2 = inlined_call_operand.vmem [shape: f32[1,96], index: 2, kind: input, shape index: {}]   ;;  %s1669_s3 = inlined_call_operand.hbm [shape: f32[2,4,8,8], index: 3, kind: output, shape index: {0}]   ;;  %s1670_s4 = inlined_call_operand.hbm [shape: f32[2,4,8,8], index: 4, kind: output, shape index: {1}]   ;;  %s1671_s5 = inlined_call_operand.hbm [shape: f32[2,4,8,8], index: 5, kind: output, shape index: {2}]  }
   0x1   :  { %1673 = sst [smem:[#allocation15_spill]] %s1666_s0 }
   0x2   :  { %1674 = sst [smem:[#allocation16_spill]] %s1667_s1 }
   0x3   :  { %11 = vsyncpa [#allocation3], 0 }
   0x4   :  { %13 = vsyncpa [#allocation3 + $0x1], 0 }
   0x5   :  { %14 = vsyncpa [#allocation6], 0 }
   0x6   :  { %15 = vsyncpa [#allocation4], 0 }
   0x7   :  { %17 = vsyncpa [#allocation4 + $0x1], 0 }
   0x8   :  { %18 = vsyncpa [#allocation9], 0 }
   0x9   :  { %20 = vsyncpa [#allocation9 + $0x1], 0  ;;  %s1306_s18 = smov 0   ;;  %s1308_s19 = smov 0  }
   0xa   :  { %s1310_s20 = smov 0   ;;  %s1312_s21 = smov 0  }
   0xb   :  { %s1314_s22 = smov 0   ;;  %s1316_s23 = smov 0  }
   0xc LB: > { %s1337_s24 = sadd.s32 4294967295, %s1262_s23   ;;  %p935_p0 = scmp.ge.s32.totalorder %s1262_s23, 1  ;;  %s1262_s23 = sphi %s1316_s23, %s26_s23   ;;  %s1258_s22 = sphi %s1314_s22, %s1687_s22   ;;  %s1254_s21 = sphi %s1312_s21, %s1686_s21   ;;  %s1250_s20 = sphi %s1310_s20, %s1685_s20   ;;  %s1246_s19 = sphi %s1308_s19, %s1684_s19   ;;  %s1242_s18 = sphi %s1306_s18, %s1683_s18  }
   0xd   : > { %p61_p1 = scmp.eq.s32.totalorder %s1337_s24, 0  ;;  %p197_p2 = scmp.lt.s32.totalorder %s1262_s23, 3 }
   0xe   : > { %s1675_s1 = sld [smem:[#allocation16_spill]]  ;;  %s1264_s29 = smov [#allocation5]  }
   0xf   : > { %p1345_p3 = pnand %p935_p0, %p197_p2  ;;  %s210_s30 = sshll.u32 %s1264_s29, 4  ;;  %s211_s30 = int_to_ptr.vmem [resolvable:$true] %s210_s30 }
  0x10   : > { %p937_p6 = scmp.ge.s32.totalorder %s1262_s23, 2  ;;  %s1265_s6 = smov 128  }
  0x11   : > { %p973_p4 = pneg %p1345_p3  ;;  %s1266_s7 = smov 8  }
  0x12   : > { %s1672_s8 = sadd.s32 4294967294, %s1262_s23   ;;  %s38_s9 = sadd.s32 1, %s1258_s22 }
  0x13   : > { %p974_p5 = pnand %p973_p4, %p61_p1  ;;  %s47_s10 = sadd.s32 1, %s1250_s20 }
  0x14   : > { %s208_s27 = sshll.u32 %s1675_s1, 4  ;;  %p40_p7 = scmp.ge.s32.totalorder %s38_s9, 2  ;;  %s209_s27 = int_to_ptr.hbm [resolvable:$true] %s208_s27 }
  0x15   : > { %976 = dma.hbm_to_vmem [thread:$0]  (!%p974_p5), %s209_s27, 512, %s211_s30, [#allocation6], %s1265_s6, %s1265_s6, %s1266_s7  }
  0x16   : > { %p54_p8 = scmp.ne.s32.totalorder %s1250_s20, %s1246_s19  ;;  %p55_p9 = scmp.eq.s32.totalorder %s1262_s23, 0 }
  0x17   : > { %p60_p10 = scmp.ne.s32.totalorder %s1246_s19, %s1242_s18  ;;  %s1689_s9 = smov (%p40_p7, %s38_s9), 0 }
  0x18   : > { %p1364_p11 = por %p55_p9, %p54_p8  ;;  %s42_s13 = ssub.s32 %s1258_s22, %s1689_s9 }
  0x19   : > { %p1370_p12 = por %p61_p1, %p60_p10  ;;  %p128_p13 = scmp.eq.s32.totalorder %s1337_s24, 1 }
  0x1a   : > { %p45_p0 = scmp.eq.s32.totalorder %s42_s13, 0  ;;  %p134_p2 = scmp.eq.s32.totalorder %s1672_s8, 1 }
  0x1b   : > { %p1379_p4 = por %p128_p13, %p54_p8  ;;  %p992_p5 = scmp.lt.s32.totalorder %s1262_s23, 2 }
  0x1c   : > { %s1385_s15 = scalar_select %p45_p0, %s1250_s20, %s47_s10  }
  0x1d   : > { %p1387_p7 = por %p134_p2, %p60_p10  ;;  %s227_s17 = sand.u32 1, %s1250_s20  }
  0x1e   : > { %s938_s25 = sshll.u32 %s227_s17, 3  ;;  %s939_s26 = sshll.u32 %s1258_s22, 3 }
  0x1f   : > { %s1681_s0 = sld [smem:[#allocation15_spill]]  ;;  %s231_s6 = scalar_lea.vmem [#allocation2], %s938_s25 }
  0x20   : > { %s240_s7 = sshll.u32 %s231_s6, 4  ;;  %p978_p8 = pnand %p992_p5, %p1364_p11  ;;  %s241_s7 = int_to_ptr.vmem [resolvable:$true] %s240_s7 }
  0x21   : > { %s228_s10 = scalar_lea.sflag [#allocation3], %s227_s17  ;;  %s1401_s8 = sand.u32 (!%p1345_p3), 1, %s1246_s19  }
  0x22   : > { %s941_s27 = sshll.u32 (!%p1345_p3), %s1401_s8, 3 }
  0x23   : > { %249 = sbr.rel (%p1345_p3) target bundleno = 461 (0x1cd), region = 32  ;;  %s255_s25 = scalar_lea.vmem (!%p1345_p3), [#allocation2], %s941_s27 }
  0x25   : > { %s236_s30 = scalar_lea.hbm %s1681_s0, %s939_s26  ;;  %s252_s26 = scalar_lea.sflag (!%p1345_p3), [#allocation3], %s1401_s8 }
  0x26   : > { %s238_s13 = sshll.u32 %s236_s30, 4  ;;  %s239_s13 = int_to_ptr.hbm [resolvable:$true] %s238_s13 }
  0x27   : > { %980 = dma.hbm_to_vmem [thread:$0]  (!%p978_p8), %s239_s13, 128, %s241_s7, %s228_s10  }
  0x28   : > { %1225 = dma.done.wait (%p1370_p12), %s252_s26, 128  }
  0x29   : > { %1227 = vsyncadd (%p1370_p12), %s252_s26, 4294967168 }
  0x2a   : > { %1229 = dma.done.wait (%p61_p1), [#allocation6], 512  }
  0x2b   : > { %1231 = vsyncadd (%p61_p1), [#allocation6], 4294966784  ;;  %v302_v0 = vld [vmem:[#allocation5 + $0x18] sm:$0xff]  ;;  %v301_v1 = vld [vmem:[#allocation5 + $0x10] sm:$0xff]  ;;  %vm307_vm0 = vcmask 261120   ;;  %s1267_s12 = smov 64  }
  0x2c   : > { %323 = vmatpush.msra.mxu0 %v302_v0  ;;  %v300_v2 = vld [vmem:[#allocation5 + $0x8] sm:$0xff]  ;;  %v299_v3 = vld [vmem:[#allocation5] sm:$0xff]  ;;  %v298_v4 = vld [vmem:[%s255_s25] sm:$0xff]  ;;  %s1268_s17 = smov 104   ;;  %s1269_s29 = smov 112   ;;  %vm342_vm1 = vcmask 1047556  }
  0x2d   : > { %v1055_v5 = vld [vmem:[%s1668_s2] ss:$0 sm:$0xff]  ;;  %s1270_s30 = smov 96   ;;  %s1271_s6 = smov 120   ;;  %v1272_v8 = vmov 1983009808  }
  0x2e   : > { %324 = vmatpush.msra.mxu0 %v301_v1  ;;  %v347_v9 = vunpack.c.l.s4 %v1272_v8  ;;  %v1273_v17 = vmov 1934713408   ;;  %s1454_s7 = sshll.u32 %s1401_s8, 5  ;;  %vm452_vm2 = vcmask 64512   ;;  %s1473_s10 = sshll.u32 %s1254_s21, 5 }
  0x2f   : > { %v371_v18 = vunpack.c.l.s4 %v1273_v17  ;;  %s283_s13 = scalar_lea.vmem [#allocation7], %s1454_s7  ;;  %s732_s25 = scalar_lea.hbm %s1669_s3, %s1473_s10 }
  0x30   : > { %325 = vmatpush.msra.mxu0 %v300_v2  ;;  %v1419_v15 = vunpack.c.0.s8 %v347_v9  ;;  %s733_s28 = sshll.u32 %s283_s13, 4  ;;  %s735_s11 = sshll.u32 %s732_s25, 4  ;;  %s734_s28 = int_to_ptr.vmem [resolvable:$true] %s733_s28  ;;  %s736_s11 = int_to_ptr.hbm [resolvable:$true] %s735_s11 }
  0x31   : > { %v1424_v23 = vunpack.c.0.s8 %v371_v18 }
  0x32   : > { %326 = vmatpush.msra.mxu0 %v299_v3 }
  0x33   : > { %946 = vmatmul.msk.f32.vlgmr.msra.gmra.mxu0 %vm307_vm0, %v298_v4 }
  0xb0   : > { %v328_v6 = vpop.f32.mrf.mxu0 }
  0xb1   : > { %v329_v7 = vadd.f32 %v1055_v5, %v328_v6 }
  0xb3   : > { %583 = vrot.lane.b32.xlu2 %v329_v7, %s1267_s12  ;;  %338 = vrot.lane.b32.xlu1 %v329_v7, %s1268_s17  ;;  %v344_v13 = vrot.slane %v329_v7, 4  ;;  %s1130_s17 = sshra.s32 %s736_s11, 4  ;;  %s1131_s17 = int_to_ptr.hbm [resolvable:$true] %s1130_s17 }
  0xb4   : > { %335 = vrot.lane.b32.xlu0 %v329_v7, %s1269_s29  ;;  %s1132_s29 = scalar_lea.hbm %s1131_s17, 32  ;;  %p1137_p10 = scmp.lt.s32.totalorder %s1131_s17, %s1669_s3 }
  0xb5   : > { %p1133_p1 = scmp.ne.s32.totalorder %s1131_s17, %s1132_s29 }
  0xb7   : > { %p1134_p3 = pnand %p1133_p1, %p1379_p4 }
  0xb9   : > { %p1135_p9 = pneg %p1134_p3 }
  0xbb   : > { %457 = vrot.lane.b32.xlu1 %v329_v7, %s1270_s30 }
  0xbc   : > { %332 = vrot.lane.b32.xlu0 %v329_v7, %s1271_s6  ;;  %s1136_s6 = scalar_lea.hbm %s1669_s3, 64 }
  0xbd   : > { %p1138_p11 = scmp.lt.s32.totalorder %s1136_s6, %s1132_s29 }
  0xbf   : > { %p1139_p12 = por %p1138_p11, %p1137_p10 }
  0xc1   : > { %p1140_p13 = pnand %p1139_p12, %p1135_p9 }
 0x125   : > { %v339_v14 = vpop.permute.xlu1 %338 }
 0x126   : > { %v336_v10 = vpop.permute.xlu0 %335  ;;  %v354_v20 = vrot.slane %v339_v14, 4 }
 0x127   : > { %v341_v11 = vrot.slane %v336_v10, 4  ;;  %587 = vrot.lane.b32.xlu0 %v336_v10, %s1267_s12  ;;  %461 = vrot.lane.b32.xlu2 %v336_v10, %s1270_s30  ;;  %v345_v16 = vsel %vm342_vm1, %v336_v10, %v344_v13 }
 0x128   : > { %v353_v21 = vperm.slane %v345_v16, %v1419_v15 }
 0x129   : > { %v343_v12 = vsel %vm342_vm1, %v341_v11, %v329_v7 }
 0x12a   : > { %v349_v19 = vperm.slane %v343_v12, %v1419_v15  ;;  %v380_v29 = vrot.slane %v353_v21, 4 }
 0x12c   : > { %v368_v26 = vrot.slane %v349_v19, 4 }
 0x12e   : > { %v333_v22 = vpop.permute.xlu0 %332 }
 0x12f   : > { %v355_v24 = vsel %vm342_vm1, %v354_v20, %v333_v22  ;;  %v356_v25 = vrot.slane %v333_v22, 4  ;;  %463 = vrot.lane.b32.xlu2 %v339_v14, %s1270_s30  ;;  %585 = vrot.lane.b32.xlu0 %v333_v22, %s1267_s12 }
 0x130   : > { %v361_v27 = vperm.slane %v355_v24, %v1419_v15  ;;  %459 = vrot.lane.b32.xlu1 %v333_v22, %s1270_s30 }
 0x131   : > { %v357_v28 = vsel %vm342_vm1, %v339_v14, %v356_v25 }
 0x132   : > { %v365_v30 = vperm.slane %v357_v28, %v1419_v15  ;;  %v366_v31 = vrot.slane %v361_v27, 4  ;;  %v369_v32 = vsel %vm342_vm1, %v361_v27, %v368_v26 }
 0x133   : > { %v377_v33 = vperm.slane %v369_v32, %v1424_v23 }
 0x134   : > { %v367_v34 = vsel %vm342_vm1, %v366_v31, %v349_v19  ;;  %v378_v35 = vrot.slane %v365_v30, 4  ;;  %v381_v36 = vsel %vm342_vm1, %v365_v30, %v380_v29 }
 0x135   : > { %v373_v37 = vperm.slane %v367_v34, %v1424_v23  ;;  %v389_v38 = vperm.slane %v381_v36, %v1424_v23  ;;  %v392_v39 = vrot.slane %v377_v33, 4 }
 0x136   : > { %v379_v40 = vsel %vm342_vm1, %v378_v35, %v353_v21 }
 0x137   : > { %v385_v41 = vperm.slane %v379_v40, %v1424_v23  ;;  %v390_v42 = vrot.slane %v373_v37, 4  ;;  %v393_v43 = vsel %vm342_vm1, 0.0, %v392_v39  ;;  %v396_v44 = vrot.slane %v389_v38, 4 }
 0x138   : > { %v398_v45 = vsel %vm342_vm1, %v392_v39, %v373_v37  ;;  %v403_v46 = vrot.slane %v393_v43, 4  ;;  %589 = vrot.lane.b32.xlu1 %v339_v14, %s1267_s12  ;;  %s710_s12 = scalar_lea.sflag [#allocation4], %s1401_s8 }
 0x139   : > { %v391_v47 = vsel %vm342_vm1, 0.0, %v390_v42  ;;  %v394_v48 = vrot.slane %v385_v41, 4  ;;  %v397_v49 = vsel %vm342_vm1, 0.0, %v396_v44  ;;  %v402_v50 = vperm.slane %v398_v45, %v1419_v15 }
 0x13a   : > { %v404_v51 = vsel %vm342_vm1, %v403_v46, %v391_v47  ;;  %v409_v52 = vsel %vm342_vm1, %v396_v44, %v385_v41  ;;  %v414_v53 = vrot.slane %v397_v49, 4 }
 0x13b   : > { %v395_v54 = vsel %vm342_vm1, 0.0, %v394_v48  ;;  %v408_v55 = vperm.slane %v404_v51, %v1419_v15  ;;  %v413_v56 = vperm.slane %v409_v52, %v1419_v15  ;;  %v422_v57 = vrot.slane %v402_v50, 4 }
 0x13c   : > { %v415_v58 = vsel %vm342_vm1, %v414_v53, %v395_v54 }
 0x13d   : > { %v419_v59 = vperm.slane %v415_v58, %v1419_v15  ;;  %v420_v60 = vrot.slane %v408_v55, 4  ;;  %v423_v61 = vsel %vm342_vm1, %v408_v55, %v422_v57  ;;  %v434_v62 = vrot.slane %v413_v56, 4 }
 0x13e   : > { %v431_v63 = vperm.slane %v423_v61, %v1424_v23 }
 0x13f   : > { %v421_v0 = vsel %vm342_vm1, %v420_v60, %v402_v50  ;;  %v432_v1 = vrot.slane %v419_v59, 4  ;;  %v435_v2 = vsel %vm342_vm1, %v419_v59, %v434_v62 }
 0x140   : > { %v427_v3 = vperm.slane %v421_v0, %v1424_v23  ;;  %v443_v4 = vperm.slane %v435_v2, %v1424_v23  ;;  %v450_v5 = vrot.slane %v431_v63, 4 }
 0x141   : > { %v433_v6 = vsel %vm342_vm1, %v432_v1, %v413_v56 }
 0x142   : > { %v439_v7 = vperm.slane %v433_v6, %v1424_v23  ;;  %v446_v8 = vrot.slane %v427_v3, 4  ;;  %v448_v9 = vrot.slane %v443_v4, 4  ;;  %v451_v10 = vsel %vm342_vm1, %v443_v4, %v450_v5 }
 0x143   : > { %456 = vst.msk [vmem:[%s283_s13 + $0x18] sm:$0xff] %vm452_vm2, %v451_v10 }
 0x144   : > { %v444_v11 = vrot.slane %v439_v7, 4  ;;  %v447_v12 = vsel %vm342_vm1, %v439_v7, %v446_v8  ;;  %v449_v13 = vsel %vm342_vm1, %v448_v9, %v431_v63 }
 0x145   : > { %454 = vst.msk [vmem:[%s283_s13 + $0x8] sm:$0xff] %vm452_vm2, %v447_v12 }
 0x146   : > { %v445_v14 = vsel %vm342_vm1, %v444_v11, %v427_v3  ;;  %455 = vst.msk [vmem:[%s283_s13 + $0x10] sm:$0xff] %vm452_vm2, %v449_v13 }
 0x147   : > { %453 = vst.msk [vmem:[%s283_s13] sm:$0xff] %vm452_vm2, %v445_v14 }
 0x148   : > { %1143 = shalt.err (!%p1140_p13)
}
 0x149   : > { %s1274_s8 = smov 128   ;;  %s1275_s13 = smov 8   ;;  %v584_v16 = vpop.permute.xlu2 %583  ;;  %v458_v18 = vpop.permute.xlu1 %457 }
 0x14a   : > { %967 = dma.vmem_to_hbm [thread:$0]  (%p1379_p4), %s734_s28, 512, %s736_s11, %s710_s12, %s1274_s8, %s1274_s8, %s1275_s13   ;;  %v471_v20 = vrot.slane %v458_v18, 4  ;;  %v597_v27 = vrot.slane %v584_v16, 4 }
 0x14b   : > { %s750_s27 = scalar_lea.hbm %s1670_s4, %s1473_s10  ;;  %s714_s26 = sand.u32 1, %s1337_s24  }
 0x14c   : > { %s290_s25 = scalar_lea.vmem [#allocation8], %s1454_s7  ;;  %s1554_s11 = sshll.u32 %s750_s27, 4  ;;  %s754_s11 = int_to_ptr.hbm [resolvable:$true] %s1554_s11 }
 0x14d   : > { %s751_s28 = sshll.u32 %s290_s25, 4  ;;  %s1579_s12 = scalar_lea.sflag [#allocation9], %s714_s26  ;;  %s1564_s28 = int_to_ptr.vmem [resolvable:$true] %s751_s28 }
 0x14e   : > { %s1158_s17 = sshra.s32 %s754_s11, 4  ;;  %s1164_s6 = scalar_lea.hbm %s1670_s4, 64  ;;  %s1159_s17 = int_to_ptr.hbm [resolvable:$true] %s1158_s17 }
 0x14f   : > { %s1160_s29 = scalar_lea.hbm %s1159_s17, 32  ;;  %p1165_p8 = scmp.lt.s32.totalorder %s1159_s17, %s1670_s4 }
 0x150   : > { %p1161_p0 = scmp.ne.s32.totalorder %s1159_s17, %s1160_s29  ;;  %p1166_p1 = scmp.lt.s32.totalorder %s1164_s6, %s1160_s29 }
 0x152   : > { %p1162_p2 = pnand %p1161_p0, %p1379_p4  ;;  %p1167_p3 = por %p1166_p1, %p1165_p8 }
 0x154   : > { %p1163_p5 = pneg %p1162_p2 }
 0x156   : > { %p1168_p9 = pnand %p1167_p3, %p1163_p5 }
 0x181   : > { %v462_v17 = vpop.permute.xlu2 %461 }
 0x182   : > { %v469_v19 = vrot.slane %v462_v17, 4  ;;  %v472_v24 = vsel %vm342_vm1, %v462_v17, %v471_v20 }
 0x183   : > { %v480_v28 = vperm.slane %v472_v24, %v1419_v15 }
 0x184   : > { %v470_v21 = vsel %vm342_vm1, %v469_v19, %v458_v18 }
 0x185   : > { %v476_v26 = vperm.slane %v470_v21, %v1419_v15  ;;  %v507_v37 = vrot.slane %v480_v28, 4 }
 0x187   : > { %v495_v35 = vrot.slane %v476_v26, 4 }
 0x189   : > { %v464_v25 = vpop.permute.xlu2 %463 }
 0x18a   : > { %v481_v29 = vrot.slane %v464_v25, 4 }
 0x199   : > { %v588_v22 = vpop.permute.xlu0 %587 }
 0x19a   : > { %v595_v31 = vrot.slane %v588_v22, 4  ;;  %v598_v32 = vsel %vm342_vm1, %v588_v22, %v597_v27 }
 0x19b   : > { %v1502_v39 = vperm.slane %v598_v32, %v1419_v15 }
 0x19c   : > { %v596_v43 = vsel %vm342_vm1, %v595_v31, %v584_v16 }
 0x19d   : > { %v602_v52 = vperm.slane %v596_v43, %v1419_v15  ;;  %v633_v53 = vrot.slane %v1502_v39, 4 }
 0x19f   : > { %v621_v13 = vrot.slane %v602_v52, 4 }
 0x1a1   : > { %v586_v45 = vpop.permute.xlu0 %585 }
 0x1a2   : > { %v460_v30 = vpop.permute.xlu1 %459  ;;  %v609_v55 = vrot.slane %v586_v45, 4 }
 0x1a3   : > { %v482_v33 = vsel %vm342_vm1, %v481_v29, %v460_v30  ;;  %v483_v34 = vrot.slane %v460_v30, 4 }
 0x1a4   : > { %v488_v36 = vperm.slane %v482_v33, %v1419_v15 }
 0x1a5   : > { %v484_v38 = vsel %vm342_vm1, %v464_v25, %v483_v34 }
 0x1a6   : > { %v492_v40 = vperm.slane %v484_v38, %v1419_v15  ;;  %v493_v41 = vrot.slane %v488_v36, 4  ;;  %v496_v42 = vsel %vm342_vm1, %v488_v36, %v495_v35 }
 0x1a7   : > { %v504_v44 = vperm.slane %v496_v42, %v1424_v23 }
 0x1a8   : > { %v494_v46 = vsel %vm342_vm1, %v493_v41, %v476_v26  ;;  %v505_v47 = vrot.slane %v492_v40, 4  ;;  %v508_v48 = vsel %vm342_vm1, %v492_v40, %v507_v37 }
 0x1a9   : > { %v500_v49 = vperm.slane %v494_v46, %v1424_v23  ;;  %v516_v50 = vperm.slane %v508_v48, %v1424_v23  ;;  %v519_v51 = vrot.slane %v504_v44, 4 }
 0x1aa   : > { %v506_v54 = vsel %vm342_vm1, %v505_v47, %v480_v28  ;;  %v590_v56 = vpop.permute.xlu1 %589 }
 0x1ab   : > { %v512_v57 = vperm.slane %v506_v54, %v1424_v23  ;;  %v517_v58 = vrot.slane %v500_v49, 4  ;;  %v520_v59 = vsel %vm342_vm1, 0.0, %v519_v51  ;;  %v523_v60 = vrot.slane %v516_v50, 4 }
 0x1ac   : > { %v525_v61 = vsel %vm342_vm1, %v519_v51, %v500_v49  ;;  %v530_v62 = vrot.slane %v520_v59, 4  ;;  %v607_v63 = vrot.slane %v590_v56, 4  ;;  %v610_v0 = vsel %vm342_vm1, %v590_v56, %v609_v55 }
 0x1ad   : > { %v518_v1 = vsel %vm342_vm1, 0.0, %v517_v58  ;;  %v521_v2 = vrot.slane %v512_v57, 4  ;;  %v524_v3 = vsel %vm342_vm1, 0.0, %v523_v60  ;;  %v529_v4 = vperm.slane %v525_v61, %v1419_v15 }
 0x1ae   : > { %v531_v5 = vsel %vm342_vm1, %v530_v62, %v518_v1  ;;  %v536_v6 = vsel %vm342_vm1, %v523_v60, %v512_v57  ;;  %v541_v7 = vrot.slane %v524_v3, 4  ;;  %v608_v8 = vsel %vm342_vm1, %v607_v63, %v586_v45 }
 0x1af   : > { %v522_v9 = vsel %vm342_vm1, 0.0, %v521_v2  ;;  %v535_v10 = vperm.slane %v531_v5, %v1419_v15  ;;  %v540_v11 = vperm.slane %v536_v6, %v1419_v15  ;;  %v549_v12 = vrot.slane %v529_v4, 4 }
 0x1b0   : > { %v542_v14 = vsel %vm342_vm1, %v541_v7, %v522_v9  ;;  %v614_v16 = vperm.slane %v608_v8, %v1419_v15  ;;  %v618_v17 = vperm.slane %v610_v0, %v1419_v15 }
 0x1b1   : > { %v546_v18 = vperm.slane %v542_v14, %v1419_v15  ;;  %v547_v19 = vrot.slane %v535_v10, 4  ;;  %v550_v20 = vsel %vm342_vm1, %v535_v10, %v549_v12  ;;  %v561_v21 = vrot.slane %v540_v11, 4 }
 0x1b2   : > { %v558_v22 = vperm.slane %v550_v20, %v1424_v23  ;;  %v619_v24 = vrot.slane %v614_v16, 4  ;;  %v622_v25 = vsel %vm342_vm1, %v614_v16, %v621_v13  ;;  %v631_v26 = vrot.slane %v618_v17, 4 }
 0x1b3   : > { %v548_v27 = vsel %vm342_vm1, %v547_v19, %v529_v4  ;;  %v559_v28 = vrot.slane %v546_v18, 4  ;;  %v562_v29 = vsel %vm342_vm1, %v546_v18, %v561_v21  ;;  %v630_v30 = vperm.slane %v622_v25, %v1424_v23 }
 0x1b4   : > { %v554_v31 = vperm.slane %v548_v27, %v1424_v23  ;;  %v570_v32 = vperm.slane %v562_v29, %v1424_v23  ;;  %v577_v33 = vrot.slane %v558_v22, 4  ;;  %v620_v34 = vsel %vm342_vm1, %v619_v24, %v602_v52 }
 0x1b5   : > { %v560_v35 = vsel %vm342_vm1, %v559_v28, %v540_v11  ;;  %v626_v36 = vperm.slane %v620_v34, %v1424_v23  ;;  %v632_v37 = vsel %vm342_vm1, %v631_v26, %v1502_v39  ;;  %v634_v38 = vsel %vm342_vm1, %v618_v17, %v633_v53 }
 0x1b6   : > { %v566_v40 = vperm.slane %v560_v35, %v1424_v23  ;;  %v573_v41 = vrot.slane %v554_v31, 4  ;;  %v575_v42 = vrot.slane %v570_v32, 4  ;;  %v578_v43 = vsel %vm342_vm1, %v570_v32, %v577_v33 }
 0x1b7   : > { %v638_v44 = vperm.slane %v632_v37, %v1424_v23  ;;  %v642_v45 = vperm.slane %v634_v38, %v1424_v23  ;;  %v643_v46 = vrot.slane %v626_v36, 4  ;;  %v645_v39 = vrot.slane %v630_v30, 4  ;;  %582 = vst.msk [vmem:[%s290_s25 + $0x18] sm:$0xff] %vm452_vm2, %v578_v43 }
 0x1b8   : > { %v571_v47 = vrot.slane %v566_v40, 4  ;;  %v574_v48 = vsel %vm342_vm1, %v566_v40, %v573_v41  ;;  %v576_v49 = vsel %vm342_vm1, %v575_v42, %v558_v22 }
 0x1b9   : > { %v644_v50 = vsel %vm342_vm1, 0.0, %v643_v46  ;;  %v646_v51 = vsel %vm342_vm1, 0.0, %v645_v39  ;;  %v647_v52 = vrot.slane %v638_v44, 4  ;;  %v649_v53 = vrot.slane %v642_v45, 4  ;;  %580 = vst.msk [vmem:[%s290_s25 + $0x8] sm:$0xff] %vm452_vm2, %v574_v48 }
 0x1ba   : > { %v572_v54 = vsel %vm342_vm1, %v571_v47, %v554_v31  ;;  %v651_v55 = vsel %vm342_vm1, %v645_v39, %v626_v36  ;;  %v656_v56 = vrot.slane %v646_v51, 4  ;;  %581 = vst.msk [vmem:[%s290_s25 + $0x10] sm:$0xff] %vm452_vm2, %v576_v49 }
 0x1bb   : > { %v648_v57 = vsel %vm342_vm1, 0.0, %v647_v52  ;;  %v650_v58 = vsel %vm342_vm1, 0.0, %v649_v53  ;;  %v655_v59 = vperm.slane %v651_v55, %v1419_v15  ;;  %v662_v60 = vsel %vm342_vm1, %v649_v53, %v638_v44  ;;  %579 = vst.msk [vmem:[%s290_s25] sm:$0xff] %vm452_vm2, %v572_v54 }
 0x1bc   : > { %v657_v61 = vsel %vm342_vm1, %v656_v56, %v644_v50  ;;  %v666_v62 = vperm.slane %v662_v60, %v1419_v15  ;;  %v667_v63 = vrot.slane %v650_v58, 4 }
 0x1bd   : > { %1171 = shalt.err (!%p1168_p9)
}
 0x1be   : > { %968 = dma.vmem_to_hbm [thread:$0]  (%p1379_p4), %s1564_s28, 512, %s754_s11, %s1579_s12, %s1274_s8, %s1274_s8, %s1275_s13   ;;  %v661_v0 = vperm.slane %v657_v61, %v1419_v15  ;;  %v675_v1 = vrot.slane %v655_v59, 4  ;;  %v668_v2 = vsel %vm342_vm1, %v667_v63, %v648_v57  ;;  %v687_v3 = vrot.slane %v666_v62, 4 }
 0x1bf   : > { %v672_v4 = vperm.slane %v668_v2, %v1419_v15  ;;  %s768_s26 = scalar_lea.hbm %s1671_s5, %s1473_s10  ;;  %s297_s28 = scalar_lea.vmem [#allocation10], %s1454_s7 }
 0x1c0   : > { %v673_v5 = vrot.slane %v661_v0, 4  ;;  %v676_v6 = vsel %vm342_vm1, %v661_v0, %v675_v1  ;;  %s1616_s25 = sshll.u32 %s768_s26, 4  ;;  %s769_s11 = sshll.u32 %s297_s28, 4  ;;  %s770_s11 = int_to_ptr.vmem [resolvable:$true] %s769_s11  ;;  %s772_s25 = int_to_ptr.hbm [resolvable:$true] %s1616_s25 }
 0x1c1   : > { %v684_v7 = vperm.slane %v676_v6, %v1424_v23  ;;  %v685_v9 = vrot.slane %v672_v4, 4  ;;  %v688_v10 = vsel %vm342_vm1, %v672_v4, %v687_v3  ;;  %s1186_s7 = sshra.s32 %s772_s25, 4  ;;  %s1192_s30 = scalar_lea.hbm %s1671_s5, 64  ;;  %s1187_s7 = int_to_ptr.hbm [resolvable:$true] %s1186_s7 }
 0x1c2   : > { %v674_v8 = vsel %vm342_vm1, %v673_v5, %v655_v59  ;;  %v696_v12 = vperm.slane %v688_v10, %v1424_v23  ;;  %s1188_s10 = scalar_lea.hbm %s1187_s7, 32  ;;  %p1193_p13 = scmp.lt.s32.totalorder %s1187_s7, %s1671_s5 }
 0x1c3   : > { %v680_v11 = vperm.slane %v674_v8, %v1424_v23  ;;  %v703_v15 = vrot.slane %v684_v7, 4  ;;  %v686_v13 = vsel %vm342_vm1, %v685_v9, %v666_v62  ;;  %p1189_p10 = scmp.ne.s32.totalorder %s1187_s7, %s1188_s10  ;;  %p1194_p0 = scmp.lt.s32.totalorder %s1192_s30, %s1188_s10 }
 0x1c4   : > { %v692_v14 = vperm.slane %v686_v13, %v1424_v23  ;;  %v701_v17 = vrot.slane %v696_v12, 4 }
 0x1c5   : > { %v699_v16 = vrot.slane %v680_v11, 4  ;;  %v704_v18 = vsel %vm342_vm1, %v696_v12, %v703_v15  ;;  %p1190_p11 = pnand %p1189_p10, %p1379_p4  ;;  %p1195_p2 = por %p1194_p0, %p1193_p13 }
 0x1c6   : > { %708 = vst.msk [vmem:[%s297_s28 + $0x18] sm:$0xff] %vm452_vm2, %v704_v18  ;;  %v697_v19 = vrot.slane %v692_v14, 4  ;;  %v702_v21 = vsel %vm342_vm1, %v701_v17, %v684_v7 }
 0x1c7   : > { %v700_v20 = vsel %vm342_vm1, %v692_v14, %v699_v16  ;;  %707 = vst.msk [vmem:[%s297_s28 + $0x10] sm:$0xff] %vm452_vm2, %v702_v21  ;;  %p1191_p12 = pneg %p1190_p11 }
 0x1c8   : > { %706 = vst.msk [vmem:[%s297_s28 + $0x8] sm:$0xff] %vm452_vm2, %v700_v20  ;;  %v698_v23 = vsel %vm342_vm1, %v697_v19, %v680_v11 }
 0x1c9   : > { %705 = vst.msk [vmem:[%s297_s28] sm:$0xff] %vm452_vm2, %v698_v23  ;;  %p1196_p5 = pnand %p1195_p2, %p1191_p12 }
 0x1cb   : > { %1199 = shalt.err (!%p1196_p5)
}
 0x1cc   : > { %969 = dma.vmem_to_hbm [thread:$0]  (%p1379_p4), %s770_s11, 512, %s772_s25, %s1579_s12, %s1274_s8, %s1274_s8, %s1275_s13  }
 0x1cd PF: > { %s786_s0 = sand.u32 1, %s1242_s18   ;;  %p982_p8 = pnand %p937_p6, %p1387_p7 }
 0x1ce   : > { %s787_s1 = scalar_lea.sflag [#allocation4], %s786_s0 }
 0x1cf   : > { %p983_p1 = pneg %p982_p8 }
 0x1d1   : > { %1233 = dma.done.wait (%p983_p1), %s787_s1, 512  }
 0x1d2   : > { %1235 = vsyncadd (%p983_p1), %s787_s1, 4294966784  ;;  %s1682_s24 = sadd.s32 4294967294, %s1262_s23  }
 0x1d3   : > { %s796_s14 = sand.u32 1, %s1682_s24  }
 0x1d4   : > { %s797_s27 = scalar_lea.sflag [#allocation9], %s796_s14 }
 0x1d5   : > { %1237 = dma.done.wait (%p983_p1), %s797_s27, 1024  }
 0x1d6   : > { %1239 = vsyncadd (%p983_p1), %s797_s27, 4294966272  ;;  %s26_s23 = sadd.s32 1, %s1262_s23   ;;  %s1683_s18 = smov %s1246_s19 }
 0x1d7   : > { %p23_p4 = scmp.ge.s32.totalorder %s26_s23, 4   ;;  %s1684_s19 = smov %s1250_s20 }
 0x1d8   : > { %s1685_s20 = smov %s1385_s15  ;;  %s1686_s21 = smov %s1258_s22 }
 0x1d9   : > { %s1687_s22 = smov %s1689_s9  ;;  %25 = sbr.rel (!%p23_p4) target bundleno = 12 (0xc), region = 113 }
 0x1de   :  { %813 = vsyncpa [#allocation3], 1 }
 0x1df   :  { %815 = vsyncpa [#allocation3 + $0x1], 1 }
 0x1e0   :  { %816 = vsyncpa [#allocation6], 1 }
 0x1e1   :  { %817 = vsyncpa [#allocation4], 1 }
 0x1e2   :  { %819 = vsyncpa [#allocation4 + $0x1], 1 }
 0x1e3   :  { %820 = vsyncpa [#allocation9], 1 }
 0x1e4   :  { %822 = vsyncpa [#allocation9 + $0x1], 1 }

</bundles_post_ra>
